<compile_context>
chip_gen: v7x
topology: tpu7x:2x2x1
jax: 0.10.0
libtpu: 0.0.40
codegen_flags: <defaults>
</compile_context>

<pallas_src>
import functools
import math

import jax
import jax.numpy as jnp
from jax import lax
from jax.experimental import pallas as pl
from jax.experimental.pallas import tpu as pltpu


# ----------------------------------------------------------------------------
# Conv kernel: 'same' conv2d (stride=1, dilation=1, groups=1, zero padding,
# 2*ph == KH-1 and 2*pw == KW-1, so OH == H and OW == W).
#
#   x_ref: (1, Cin, H*W)      flattened NCHW image of one batch element
#   w_ref: (TOC, KH*KW*Cin)   composed DO-Conv weight, tap-major columns
#   b_ref: (TOC, 1)           bias
#   o_ref: (1, TOC, H*W)      flattened NCHW output block (lane-dense store)
#   p_ref: (KH*KW*Cin, H*W)   VMEM scratch: im2col patch matrix
# ----------------------------------------------------------------------------
def _doconv_same_kernel(x_ref, w_ref, b_ref, o_ref, p_ref,
                        *, KH, KW, ph, pw, W):
    Cin = x_ref.shape[1]
    HW = x_ref.shape[2]

    x = x_ref[0]                                              # (Cin, HW)
    # source column index iw of every flattened pixel
    col = lax.broadcasted_iota(jnp.int32, (Cin, HW), 1) % W

    # Structural zeros (taps shifted past the top/bottom rows of the image).
    p_ref[...] = jnp.zeros(p_ref.shape, p_ref.dtype)

    # Build the im2col patch matrix:
    #   P[(kh*KW + kw)*Cin + c, oh*W + ow] = x_padded[c, oh + kh, ow + kw]
    # Valid because OW == W and OH == H ('same' conv), so the flat output
    # index equals the flat input index plus a constant per-tap shift.
    for kh in range(KH):
        for kw in range(KW):
            d = kw - pw
            s = (kh - ph) * W + d                             # flat shift
            # zero columns that would wrap across image rows for this tap
            xm = jnp.where(jnp.logical_and(col - d >= 0, col - d < W),
                           x, jnp.zeros_like(x))
            row0 = (kh * KW + kw) * Cin
            if s >= 0:
                L = HW - s
                if L > 0:
                    p_ref[row0:row0 + Cin, 0:L] = xm[:, s:s + L]
            else:
                a = -s
                L = HW - a
                if L > 0:
                    p_ref[row0:row0 + Cin, a:a + L] = xm[:, 0:L]

    # Single MXU matmul per output tile: (TOC, K) @ (K, HW) -> (TOC, HW).
    acc = jnp.dot(w_ref[...], p_ref[...], preferred_element_type=jnp.float32)
    o_ref[0] = (acc + b_ref[...]).astype(o_ref.dtype)


def _pick_oc_tile(oc):
    if oc <= 128:
        return oc
    for t in (128, 64, 32, 16, 8):
        if oc % t == 0:
            return t
    return oc


def conv2d_same_pallas(x, w_mat, bias, *, kernel_size, padding):
    """'same' conv2d, NCHW in / NCHW out, weight already in (OC, KH*KW*Cin)."""
    B, Cin, H, W = x.shape
    KH, KW = kernel_size
    ph, pw = padding
    OC, K = w_mat.shape
    assert K == KH * KW * Cin
    # TODO(synk): only stride=1, dilation=1, groups=1, padding_mode='zeros' and
    # 'same' spatial padding (2*ph == KH-1, 2*pw == KW-1) are implemented; the
    # general case needs an in-kernel padded-row scratch + output compaction.
    if 2 * ph != KH - 1 or 2 * pw != KW - 1:
        raise NotImplementedError("only 'same' zero padding is implemented")

    HW = H * W
    toc = _pick_oc_tile(OC)
    x_flat = x.reshape(B, Cin, HW)          # contiguous reshape: free
    b2 = bias.reshape(OC, 1)

    # TODO(synk): for large H*W add a spatial row-tile grid axis (halo fetch)
    # so the per-step VMEM footprint stays bounded on v7x's 64 MiB VMEM.
    kernel = functools.partial(_doconv_same_kernel,
                               KH=KH, KW=KW, ph=ph, pw=pw, W=W)
    out_flat = pl.pallas_call(
        kernel,
        out_shape=jax.ShapeDtypeStruct((B, OC, HW), x.dtype),
        grid_spec=pltpu.PrefetchScalarGridSpec(
            num_scalar_prefetch=0,
            grid=(B, OC // toc),
            in_specs=[
                pl.BlockSpec((1, Cin, HW), lambda b, o: (b, 0, 0)),
                pl.BlockSpec((toc, K), lambda b, o: (o, 0)),
                pl.BlockSpec((toc, 1), lambda b, o: (o, 0)),
            ],
            out_specs=pl.BlockSpec((1, toc, HW), lambda b, o: (b, o, 0)),
            scratch_shapes=[pltpu.VMEM((K, HW), jnp.float32)],
        ),
        compiler_params=pltpu.CompilerParams(
            dimension_semantics=("parallel", "parallel")),
    )(x_flat, w_mat, b2)
    return out_flat.reshape(B, OC, H, W)    # contiguous reshape: free


# ----------------------------------------------------------------------------
# DOConv2d forward (groups=1): compose the over-parameterized weight directly
# into the conv kernel's tap-major (OC, KH*KW*Cin) layout, then convolve.
# ----------------------------------------------------------------------------
def doconv2d_forward(x, W, D, d_diag, bias, *, kernel_size, padding):
    M, N = kernel_size
    MN = M * N
    B, Cin, H, Wd = x.shape
    OC, _, D_mul = W.shape

    if MN > 1:
        D_eff = D + d_diag                                  # (Cin, MN, D_mul)
        # DoW[o, c, m] = sum_s D_eff[c, m, s] * W[o, c, s]; emitted as
        # w_mat[o, m*Cin + c]  (tap-major), matching the kernel's P layout.
        w_mat = jnp.einsum('cms,ocs->omc', D_eff, W).reshape(OC, MN * Cin)
    else:
        w_mat = W.reshape(OC, Cin)                          # D_mul == 1
    return conv2d_same_pallas(x, w_mat, bias,
                              kernel_size=kernel_size, padding=padding)


# ----------------------------------------------------------------------------
# main
# ----------------------------------------------------------------------------
if __name__ == "__main__":
    key = jax.random.PRNGKey(0)
    k1, k2, k3, k4 = jax.random.split(key, 4)

    # module config (DO-Conv: groups=1)
    in_channels, out_channels = 4, 8
    M = N = 3
    MN = M * N
    D_mul = MN                          # default depth multiplier
    padding = (1, 1)                    # 'same' padding for a 3x3 kernel

    # deterministic parameter init (shapes from DOConv2d.__init__)
    fan_in = in_channels * D_mul
    bound_w = math.sqrt(6.0 / fan_in)   # kaiming_uniform(a=sqrt(5)) style bound
    W = jax.random.uniform(k1, (out_channels, in_channels, D_mul),
                           jnp.float32, -bound_w, bound_w)
    # D is zero-initialised in the module; use small random values here so the
    # over-parameterization path (D + d_diag) is actually exercised.
    D = 0.1 * jax.random.normal(k2, (in_channels, MN, D_mul), jnp.float32)
    eye = jnp.eye(MN, dtype=jnp.float32).reshape(1, MN, MN)
    d_diag = jnp.tile(eye, (in_channels, 1, D_mul // MN))
    if D_mul % MN != 0:                 # mirror the module's remainder handling
        d_diag = jnp.concatenate(
            [d_diag, jnp.zeros((in_channels, MN, D_mul % MN), jnp.float32)],
            axis=2)
    bound_b = 1.0 / math.sqrt(fan_in)
    bias = jax.random.uniform(k3, (out_channels,), jnp.float32,
                              -bound_b, bound_b)

    # input (NCHW, like PyTorch)
    x = jax.random.normal(k4, (2, in_channels, 16, 16), jnp.float32)

    y = doconv2d_forward(x, W, D, d_diag, bias,
                         kernel_size=(M, N), padding=padding)
    y = jax.block_until_ready(y)

    # pure-JAX reference (module formula, independent code path)
    D_eff = D + d_diag
    DoW_ref = jnp.einsum('ims,ois->oim', D_eff, W).reshape(
        out_channels, in_channels, M, N)
    y_ref = lax.conv_general_dilated(
        x, DoW_ref, window_strides=(1, 1),
        padding=((padding[0], padding[0]), (padding[1], padding[1])),
        dimension_numbers=('NCHW', 'OIHW', 'NCHW'),
    ) + bias[None, :, None, None]

    assert y.shape == y_ref.shape == (2, out_channels, 16, 16)
    err = jnp.max(jnp.abs(y - y_ref))
    assert jnp.allclose(y, y_ref, rtol=1e-4, atol=1e-4), f"max err {err}"
    print("KERNEL_OK")
</pallas_src>

<mosaic_0001>
module attributes {stable_mosaic.version = 11 : i64} {
  func.func @_doconv_same_kernel(%arg0: i32, %arg1: i32, %arg2: memref<1x4x256xf32, #tpu.memory_space<vmem>>, %arg3: memref<8x36xf32, #tpu.memory_space<vmem>>, %arg4: memref<8x1xf32, #tpu.memory_space<vmem>>, %arg5: memref<1x8x256xf32, #tpu.memory_space<vmem>>, %arg6: memref<36x256xf32, #tpu.memory_space<vmem>>) attributes {dimension_semantics = [#tpu.dimension_semantics<parallel>, #tpu.dimension_semantics<parallel>], iteration_bounds = array<i64: 2, 1>, scalar_prefetch = 0 : i64, scratch_operands = 1 : i64, tpu.core_type = #tpu.core_type<tc>, window_params = [{transform_indices = @transform_0, window_bounds = array<i64: 1, 4, 256>}, {transform_indices = @transform_1, window_bounds = array<i64: 8, 36>}, {transform_indices = @transform_2, window_bounds = array<i64: 8, 1>}, {transform_indices = @transform_3, window_bounds = array<i64: 1, 8, 256>}]} {
    %c0 = arith.constant 0 : index
    %c0_0 = arith.constant 0 : index
    %c0_1 = arith.constant 0 : index
    %0 = vector.load %arg2[%c0, %c0_0, %c0_1] : memref<1x4x256xf32, #tpu.memory_space<vmem>>, vector<1x4x256xf32>
    %1 = vector.shape_cast %0 : vector<1x4x256xf32> to vector<4x256xf32>
    %2 = tpu.iota {dimensions = array<i32: 1>} : vector<4x256xi32>
    %c16_i32 = arith.constant 16 : i32
    %c0_i32 = arith.constant 0 : i32
    %3 = arith.cmpi eq, %c16_i32, %c0_i32 : i32
    %c1_i32 = arith.constant 1 : i32
    %4 = arith.select %3, %c1_i32, %c16_i32 : i32
    %5 = vector.broadcast %4 : i32 to vector<4x256xi32>
    %6 = arith.remsi %2, %5 : vector<4x256xi32>
    %c0_i32_2 = arith.constant 0 : i32
    %7 = vector.broadcast %c0_i32_2 : i32 to vector<4x256xi32>
    %8 = arith.cmpi ne, %6, %7 : vector<4x256xi32>
    %c0_i32_3 = arith.constant 0 : i32
    %9 = vector.broadcast %c0_i32_3 : i32 to vector<4x256xi32>
    %10 = arith.cmpi slt, %6, %9 : vector<4x256xi32>
    %c0_i32_4 = arith.constant 0 : i32
    %11 = arith.cmpi slt, %4, %c0_i32_4 : i32
    %12 = vector.broadcast %11 : i1 to vector<4x256xi1>
    %13 = vector.broadcast %12 : vector<4x256xi1> to vector<4x256xi1>
    %14 = arith.xori %10, %13 : vector<4x256xi1>
    %15 = arith.andi %14, %8 : vector<4x256xi1>
    %16 = vector.broadcast %4 : i32 to vector<4x256xi32>
    %17 = arith.addi %6, %16 : vector<4x256xi32>
    %18 = arith.select %15, %17, %6 : vector<4x256xi1>, vector<4x256xi32>
    %cst = arith.constant 0.000000e+00 : f32
    %19 = vector.broadcast %cst : f32 to vector<36x256xf32>
    %c0_5 = arith.constant 0 : index
    %c0_6 = arith.constant 0 : index
    %20 = vector.load %arg6[%c0_5, %c0_6] : memref<36x256xf32, #tpu.memory_space<vmem>>, vector<36x256xf32>
    tpu.vector_store %arg6[%c0_5, %c0_6], %19 {strides = array<i32>} : memref<36x256xf32, #tpu.memory_space<vmem>>, vector<36x256xf32>,
    %c-1_i32 = arith.constant -1 : i32
    %21 = vector.broadcast %c-1_i32 : i32 to vector<4x256xi32>
    %22 = arith.subi %18, %21 : vector<4x256xi32>
    %c0_i32_7 = arith.constant 0 : i32
    %23 = vector.broadcast %c0_i32_7 : i32 to vector<4x256xi32>
    %24 = arith.cmpi sge, %22, %23 : vector<4x256xi32>
    %c-1_i32_8 = arith.constant -1 : i32
    %25 = vector.broadcast %c-1_i32_8 : i32 to vector<4x256xi32>
    %26 = arith.subi %18, %25 : vector<4x256xi32>
    %c16_i32_9 = arith.constant 16 : i32
    %27 = vector.broadcast %c16_i32_9 : i32 to vector<4x256xi32>
    %28 = arith.cmpi slt, %26, %27 : vector<4x256xi32>
    %29 = arith.andi %24, %28 : vector<4x256xi1>
    %cst_10 = arith.constant 0.000000e+00 : f32
    %30 = vector.broadcast %cst_10 : f32 to vector<4x256xf32>
    %31 = arith.select %29, %1, %30 : vector<4x256xi1>, vector<4x256xf32>
    %32 = vector.extract_strided_slice %31 {offsets = [0, 0], sizes = [4, 239], strides = [1, 1]} : vector<4x256xf32> to vector<4x239xf32>
    %c0_11 = arith.constant 0 : index
    %c17 = arith.constant 17 : index
    %33 = vector.load %arg6[%c0_11, %c17] : memref<36x256xf32, #tpu.memory_space<vmem>>, vector<4x239xf32>
    tpu.vector_store %arg6[%c0_11, %c17], %32 {strides = array<i32>} : memref<36x256xf32, #tpu.memory_space<vmem>>, vector<4x239xf32>,
    %c0_i32_12 = arith.constant 0 : i32
    %34 = vector.broadcast %c0_i32_12 : i32 to vector<4x256xi32>
    %35 = arith.subi %18, %34 : vector<4x256xi32>
    %c0_i32_13 = arith.constant 0 : i32
    %36 = vector.broadcast %c0_i32_13 : i32 to vector<4x256xi32>
    %37 = arith.cmpi sge, %35, %36 : vector<4x256xi32>
    %c0_i32_14 = arith.constant 0 : i32
    %38 = vector.broadcast %c0_i32_14 : i32 to vector<4x256xi32>
    %39 = arith.subi %18, %38 : vector<4x256xi32>
    %c16_i32_15 = arith.constant 16 : i32
    %40 = vector.broadcast %c16_i32_15 : i32 to vector<4x256xi32>
    %41 = arith.cmpi slt, %39, %40 : vector<4x256xi32>
    %42 = arith.andi %37, %41 : vector<4x256xi1>
    %cst_16 = arith.constant 0.000000e+00 : f32
    %43 = vector.broadcast %cst_16 : f32 to vector<4x256xf32>
    %44 = arith.select %42, %1, %43 : vector<4x256xi1>, vector<4x256xf32>
    %45 = vector.extract_strided_slice %44 {offsets = [0, 0], sizes = [4, 240], strides = [1, 1]} : vector<4x256xf32> to vector<4x240xf32>
    %c4 = arith.constant 4 : index
    %c16 = arith.constant 16 : index
    %46 = vector.load %arg6[%c4, %c16] : memref<36x256xf32, #tpu.memory_space<vmem>>, vector<4x240xf32>
    tpu.vector_store %arg6[%c4, %c16], %45 {strides = array<i32>} : memref<36x256xf32, #tpu.memory_space<vmem>>, vector<4x240xf32>,
    %c1_i32_17 = arith.constant 1 : i32
    %47 = vector.broadcast %c1_i32_17 : i32 to vector<4x256xi32>
    %48 = arith.subi %18, %47 : vector<4x256xi32>
    %c0_i32_18 = arith.constant 0 : i32
    %49 = vector.broadcast %c0_i32_18 : i32 to vector<4x256xi32>
    %50 = arith.cmpi sge, %48, %49 : vector<4x256xi32>
    %c1_i32_19 = arith.constant 1 : i32
    %51 = vector.broadcast %c1_i32_19 : i32 to vector<4x256xi32>
    %52 = arith.subi %18, %51 : vector<4x256xi32>
    %c16_i32_20 = arith.constant 16 : i32
    %53 = vector.broadcast %c16_i32_20 : i32 to vector<4x256xi32>
    %54 = arith.cmpi slt, %52, %53 : vector<4x256xi32>
    %55 = arith.andi %50, %54 : vector<4x256xi1>
    %cst_21 = arith.constant 0.000000e+00 : f32
    %56 = vector.broadcast %cst_21 : f32 to vector<4x256xf32>
    %57 = arith.select %55, %1, %56 : vector<4x256xi1>, vector<4x256xf32>
    %58 = vector.extract_strided_slice %57 {offsets = [0, 0], sizes = [4, 241], strides = [1, 1]} : vector<4x256xf32> to vector<4x241xf32>
    %c8 = arith.constant 8 : index
    %c15 = arith.constant 15 : index
    %59 = vector.load %arg6[%c8, %c15] : memref<36x256xf32, #tpu.memory_space<vmem>>, vector<4x241xf32>
    tpu.vector_store %arg6[%c8, %c15], %58 {strides = array<i32>} : memref<36x256xf32, #tpu.memory_space<vmem>>, vector<4x241xf32>,
    %c-1_i32_22 = arith.constant -1 : i32
    %60 = vector.broadcast %c-1_i32_22 : i32 to vector<4x256xi32>
    %61 = arith.subi %18, %60 : vector<4x256xi32>
    %c0_i32_23 = arith.constant 0 : i32
    %62 = vector.broadcast %c0_i32_23 : i32 to vector<4x256xi32>
    %63 = arith.cmpi sge, %61, %62 : vector<4x256xi32>
    %c-1_i32_24 = arith.constant -1 : i32
    %64 = vector.broadcast %c-1_i32_24 : i32 to vector<4x256xi32>
    %65 = arith.subi %18, %64 : vector<4x256xi32>
    %c16_i32_25 = arith.constant 16 : i32
    %66 = vector.broadcast %c16_i32_25 : i32 to vector<4x256xi32>
    %67 = arith.cmpi slt, %65, %66 : vector<4x256xi32>
    %68 = arith.andi %63, %67 : vector<4x256xi1>
    %cst_26 = arith.constant 0.000000e+00 : f32
    %69 = vector.broadcast %cst_26 : f32 to vector<4x256xf32>
    %70 = arith.select %68, %1, %69 : vector<4x256xi1>, vector<4x256xf32>
    %71 = vector.extract_strided_slice %70 {offsets = [0, 0], sizes = [4, 255], strides = [1, 1]} : vector<4x256xf32> to vector<4x255xf32>
    %c12 = arith.constant 12 : index
    %c1 = arith.constant 1 : index
    %72 = vector.load %arg6[%c12, %c1] : memref<36x256xf32, #tpu.memory_space<vmem>>, vector<4x255xf32>
    tpu.vector_store %arg6[%c12, %c1], %71 {strides = array<i32>} : memref<36x256xf32, #tpu.memory_space<vmem>>, vector<4x255xf32>,
    %c0_i32_27 = arith.constant 0 : i32
    %73 = vector.broadcast %c0_i32_27 : i32 to vector<4x256xi32>
    %74 = arith.subi %18, %73 : vector<4x256xi32>
    %c0_i32_28 = arith.constant 0 : i32
    %75 = vector.broadcast %c0_i32_28 : i32 to vector<4x256xi32>
    %76 = arith.cmpi sge, %74, %75 : vector<4x256xi32>
    %c0_i32_29 = arith.constant 0 : i32
    %77 = vector.broadcast %c0_i32_29 : i32 to vector<4x256xi32>
    %78 = arith.subi %18, %77 : vector<4x256xi32>
    %c16_i32_30 = arith.constant 16 : i32
    %79 = vector.broadcast %c16_i32_30 : i32 to vector<4x256xi32>
    %80 = arith.cmpi slt, %78, %79 : vector<4x256xi32>
    %81 = arith.andi %76, %80 : vector<4x256xi1>
    %cst_31 = arith.constant 0.000000e+00 : f32
    %82 = vector.broadcast %cst_31 : f32 to vector<4x256xf32>
    %83 = arith.select %81, %1, %82 : vector<4x256xi1>, vector<4x256xf32>
    %c16_32 = arith.constant 16 : index
    %c0_33 = arith.constant 0 : index
    %84 = vector.load %arg6[%c16_32, %c0_33] : memref<36x256xf32, #tpu.memory_space<vmem>>, vector<4x256xf32>
    tpu.vector_store %arg6[%c16_32, %c0_33], %83 {strides = array<i32>} : memref<36x256xf32, #tpu.memory_space<vmem>>, vector<4x256xf32>,
    %c1_i32_34 = arith.constant 1 : i32
    %85 = vector.broadcast %c1_i32_34 : i32 to vector<4x256xi32>
    %86 = arith.subi %18, %85 : vector<4x256xi32>
    %c0_i32_35 = arith.constant 0 : i32
    %87 = vector.broadcast %c0_i32_35 : i32 to vector<4x256xi32>
    %88 = arith.cmpi sge, %86, %87 : vector<4x256xi32>
    %c1_i32_36 = arith.constant 1 : i32
    %89 = vector.broadcast %c1_i32_36 : i32 to vector<4x256xi32>
    %90 = arith.subi %18, %89 : vector<4x256xi32>
    %c16_i32_37 = arith.constant 16 : i32
    %91 = vector.broadcast %c16_i32_37 : i32 to vector<4x256xi32>
    %92 = arith.cmpi slt, %90, %91 : vector<4x256xi32>
    %93 = arith.andi %88, %92 : vector<4x256xi1>
    %cst_38 = arith.constant 0.000000e+00 : f32
    %94 = vector.broadcast %cst_38 : f32 to vector<4x256xf32>
    %95 = arith.select %93, %1, %94 : vector<4x256xi1>, vector<4x256xf32>
    %96 = vector.extract_strided_slice %95 {offsets = [0, 1], sizes = [4, 255], strides = [1, 1]} : vector<4x256xf32> to vector<4x255xf32>
    %c20 = arith.constant 20 : index
    %c0_39 = arith.constant 0 : index
    %97 = vector.load %arg6[%c20, %c0_39] : memref<36x256xf32, #tpu.memory_space<vmem>>, vector<4x255xf32>
    tpu.vector_store %arg6[%c20, %c0_39], %96 {strides = array<i32>} : memref<36x256xf32, #tpu.memory_space<vmem>>, vector<4x255xf32>,
    %c-1_i32_40 = arith.constant -1 : i32
    %98 = vector.broadcast %c-1_i32_40 : i32 to vector<4x256xi32>
    %99 = arith.subi %18, %98 : vector<4x256xi32>
    %c0_i32_41 = arith.constant 0 : i32
    %100 = vector.broadcast %c0_i32_41 : i32 to vector<4x256xi32>
    %101 = arith.cmpi sge, %99, %100 : vector<4x256xi32>
    %c-1_i32_42 = arith.constant -1 : i32
    %102 = vector.broadcast %c-1_i32_42 : i32 to vector<4x256xi32>
    %103 = arith.subi %18, %102 : vector<4x256xi32>
    %c16_i32_43 = arith.constant 16 : i32
    %104 = vector.broadcast %c16_i32_43 : i32 to vector<4x256xi32>
    %105 = arith.cmpi slt, %103, %104 : vector<4x256xi32>
    %106 = arith.andi %101, %105 : vector<4x256xi1>
    %cst_44 = arith.constant 0.000000e+00 : f32
    %107 = vector.broadcast %cst_44 : f32 to vector<4x256xf32>
    %108 = arith.select %106, %1, %107 : vector<4x256xi1>, vector<4x256xf32>
    %109 = vector.extract_strided_slice %108 {offsets = [0, 15], sizes = [4, 241], strides = [1, 1]} : vector<4x256xf32> to vector<4x241xf32>
    %c24 = arith.constant 24 : index
    %c0_45 = arith.constant 0 : index
    %110 = vector.load %arg6[%c24, %c0_45] : memref<36x256xf32, #tpu.memory_space<vmem>>, vector<4x241xf32>
    tpu.vector_store %arg6[%c24, %c0_45], %109 {strides = array<i32>} : memref<36x256xf32, #tpu.memory_space<vmem>>, vector<4x241xf32>,
    %c0_i32_46 = arith.constant 0 : i32
    %111 = vector.broadcast %c0_i32_46 : i32 to vector<4x256xi32>
    %112 = arith.subi %18, %111 : vector<4x256xi32>
    %c0_i32_47 = arith.constant 0 : i32
    %113 = vector.broadcast %c0_i32_47 : i32 to vector<4x256xi32>
    %114 = arith.cmpi sge, %112, %113 : vector<4x256xi32>
    %c0_i32_48 = arith.constant 0 : i32
    %115 = vector.broadcast %c0_i32_48 : i32 to vector<4x256xi32>
    %116 = arith.subi %18, %115 : vector<4x256xi32>
    %c16_i32_49 = arith.constant 16 : i32
    %117 = vector.broadcast %c16_i32_49 : i32 to vector<4x256xi32>
    %118 = arith.cmpi slt, %116, %117 : vector<4x256xi32>
    %119 = arith.andi %114, %118 : vector<4x256xi1>
    %cst_50 = arith.constant 0.000000e+00 : f32
    %120 = vector.broadcast %cst_50 : f32 to vector<4x256xf32>
    %121 = arith.select %119, %1, %120 : vector<4x256xi1>, vector<4x256xf32>
    %122 = vector.extract_strided_slice %121 {offsets = [0, 16], sizes = [4, 240], strides = [1, 1]} : vector<4x256xf32> to vector<4x240xf32>
    %c28 = arith.constant 28 : index
    %c0_51 = arith.constant 0 : index
    %123 = vector.load %arg6[%c28, %c0_51] : memref<36x256xf32, #tpu.memory_space<vmem>>, vector<4x240xf32>
    tpu.vector_store %arg6[%c28, %c0_51], %122 {strides = array<i32>} : memref<36x256xf32, #tpu.memory_space<vmem>>, vector<4x240xf32>,
    %c1_i32_52 = arith.constant 1 : i32
    %124 = vector.broadcast %c1_i32_52 : i32 to vector<4x256xi32>
    %125 = arith.subi %18, %124 : vector<4x256xi32>
    %c0_i32_53 = arith.constant 0 : i32
    %126 = vector.broadcast %c0_i32_53 : i32 to vector<4x256xi32>
    %127 = arith.cmpi sge, %125, %126 : vector<4x256xi32>
    %c1_i32_54 = arith.constant 1 : i32
    %128 = vector.broadcast %c1_i32_54 : i32 to vector<4x256xi32>
    %129 = arith.subi %18, %128 : vector<4x256xi32>
    %c16_i32_55 = arith.constant 16 : i32
    %130 = vector.broadcast %c16_i32_55 : i32 to vector<4x256xi32>
    %131 = arith.cmpi slt, %129, %130 : vector<4x256xi32>
    %132 = arith.andi %127, %131 : vector<4x256xi1>
    %cst_56 = arith.constant 0.000000e+00 : f32
    %133 = vector.broadcast %cst_56 : f32 to vector<4x256xf32>
    %134 = arith.select %132, %1, %133 : vector<4x256xi1>, vector<4x256xf32>
    %135 = vector.extract_strided_slice %134 {offsets = [0, 17], sizes = [4, 239], strides = [1, 1]} : vector<4x256xf32> to vector<4x239xf32>
    %c32 = arith.constant 32 : index
    %c0_57 = arith.constant 0 : index
    %136 = vector.load %arg6[%c32, %c0_57] : memref<36x256xf32, #tpu.memory_space<vmem>>, vector<4x239xf32>
    tpu.vector_store %arg6[%c32, %c0_57], %135 {strides = array<i32>} : memref<36x256xf32, #tpu.memory_space<vmem>>, vector<4x239xf32>,
    %c0_58 = arith.constant 0 : index
    %c0_59 = arith.constant 0 : index
    %137 = vector.load %arg3[%c0_58, %c0_59] : memref<8x36xf32, #tpu.memory_space<vmem>>, vector<8x36xf32>
    %c0_60 = arith.constant 0 : index
    %c0_61 = arith.constant 0 : index
    %138 = vector.load %arg6[%c0_60, %c0_61] : memref<36x256xf32, #tpu.memory_space<vmem>>, vector<36x256xf32>
    %cst_62 = arith.constant dense<0.000000e+00> : vector<8x256xf32>
    %139 = tpu.matmul %137, %138, %cst_62 {dimension_numbers = #tpu.dot_dimension_numbers<[1], [0], [0], [1], [0, 0, 1, 1], [], []>} : vector<8x36xf32>, vector<36x256xf32>, vector<8x256xf32> -> vector<8x256xf32>
    %c0_63 = arith.constant 0 : index
    %c0_64 = arith.constant 0 : index
    %140 = vector.load %arg4[%c0_63, %c0_64] : memref<8x1xf32, #tpu.memory_space<vmem>>, vector<8x1xf32>
    %141 = vector.broadcast %140 : vector<8x1xf32> to vector<8x256xf32>
    %142 = arith.addf %139, %141 : vector<8x256xf32>
    %c0_65 = arith.constant 0 : index
    %c0_66 = arith.constant 0 : index
    %c0_67 = arith.constant 0 : index
    %143 = vector.load %arg5[%c0_65, %c0_66, %c0_67] : memref<1x8x256xf32, #tpu.memory_space<vmem>>, vector<1x8x256xf32>
    %144 = vector.shape_cast %143 : vector<1x8x256xf32> to vector<8x256xf32>
    %145 = vector.shape_cast %142 : vector<8x256xf32> to vector<1x8x256xf32>
    tpu.vector_store %arg5[%c0_65, %c0_66, %c0_67], %145 {strides = array<i32>} : memref<1x8x256xf32, #tpu.memory_space<vmem>>, vector<1x8x256xf32>,
    return
  }
  func.func @transform_0(%arg0: i32, %arg1: i32) -> (i32, i32, i32) {
    %c0_i32 = arith.constant 0 : i32
    %c0_i32_0 = arith.constant 0 : i32
    %c0_i32_1 = arith.constant 0 : i32
    return %arg0, %c0_i32, %c0_i32_0 : i32, i32, i32
  }
  func.func @transform_1(%arg0: i32, %arg1: i32) -> (i32, i32) {
    %c0_i32 = arith.constant 0 : i32
    %c0_i32_0 = arith.constant 0 : i32
    return %arg1, %c0_i32 : i32, i32
  }
  func.func @transform_2(%arg0: i32, %arg1: i32) -> (i32, i32) {
    %c0_i32 = arith.constant 0 : i32
    %c0_i32_0 = arith.constant 0 : i32
    return %arg1, %c0_i32 : i32, i32
  }
  func.func @transform_3(%arg0: i32, %arg1: i32) -> (i32, i32, i32) {
    %c0_i32 = arith.constant 0 : i32
    %c0_i32_0 = arith.constant 0 : i32
    return %arg0, %arg1, %c0_i32 : i32, i32, i32
  }
}

</mosaic_0001>

<bundles_post_ra>
// kernel: tpu_custom_call.1
= control target key start
LH: loop header
LB: loop body
LE: loop exit
PB: predicated region body
PF: predicated region fallthrough
CT: control target
= control target key end

     0   :  { %8 = vsyncpa [#allocation4], 0  ;;  %s1068_s0 = inlined_call_operand.hbm [shape: f32[2,4,256], index: 0, kind: input, shape index: {}]   ;;  %s1069_s1 = inlined_call_operand.vmem [shape: f32[8,36], index: 1, kind: input, shape index: {}]   ;;  %s1070_s2 = inlined_call_operand.vmem [shape: f32[8,1], index: 2, kind: input, shape index: {}]   ;;  %s1071_s3 = inlined_call_operand.hbm [shape: f32[2,8,256], index: 3, kind: output, shape index: {}]  }
   0x1   :  { %10 = vsyncpa [#allocation4 + $0x1], 0 }
   0x2   :  { %11 = vsyncpa [#allocation5], 0 }
   0x3   :  { %13 = vsyncpa [#allocation5 + $0x1], 0  ;;  %s889_s12 = smov 0   ;;  %s891_s13 = smov 0  }
   0x4   :  { %s893_s14 = smov 0   ;;  %s895_s15 = smov 0  }
   0x5   :  { %s897_s16 = smov 0   ;;  %s899_s17 = smov 0  }
   0x6 LB: > { %s635_s18 = sadd.s32 4294967295, %s855_s17   ;;  %s636_s19 = sadd.s32 4294967294, %s855_s17   ;;  %s855_s17 = sphi %s899_s17, %s19_s17   ;;  %s851_s16 = sphi %s897_s16, %s1087_s16   ;;  %s847_s15 = sphi %s895_s15, %s1086_s15   ;;  %s843_s14 = sphi %s893_s14, %s1085_s14   ;;  %s839_s13 = sphi %s891_s13, %s1084_s13   ;;  %s835_s12 = sphi %s889_s12, %s1083_s12  }
   0x7   : > { %s31_s20 = sadd.s32 1, %s851_s16  ;;  %s38_s21 = sadd.s32 1, %s843_s14 }
   0x8   : > { %p33_p0 = scmp.ge.s32.totalorder %s31_s20, 2  ;;  %p45_p1 = scmp.ne.s32.totalorder %s843_s14, %s839_s13 }
   0x9   : > { %p46_p2 = scmp.eq.s32.totalorder %s855_s17, 0  ;;  %p51_p3 = scmp.ne.s32.totalorder %s839_s13, %s835_s12 }
   0xa   : > { %s1089_s20 = smov (%p33_p0, %s31_s20), 0  ;;  %p52_p5 = scmp.eq.s32.totalorder %s635_s18, 0 }
   0xb   : > { %p930_p4 = por %p46_p2, %p45_p1  ;;  %s35_s23 = ssub.s32 %s851_s16, %s1089_s20 }
   0xc   : > { %p129_p6 = scmp.eq.s32.totalorder %s635_s18, 1  ;;  %p36_p7 = scmp.eq.s32.totalorder %s35_s23, 0 }
   0xd   : > { %p936_p8 = por %p52_p5, %p51_p3  ;;  %p135_p10 = scmp.eq.s32.totalorder %s636_s19, 1 }
   0xe   : > { %p940_p9 = por %p129_p6, %p45_p1  ;;  %p681_p13 = scmp.lt.s32.totalorder %s855_s17, 2 }
   0xf   : > { %s945_s26 = scalar_select %p36_p7, %s843_s14, %s38_s21  }
  0x10   : > { %s1075_s25 = scalar_select %p940_p9, 1, 0 }
  0x11   : > { %p947_p11 = por %p135_p10, %p51_p3  ;;  %s169_s28 = sand.u32 1, %s843_s14  }
  0x12   : > { %s641_s29 = sshll.u32 %s169_s28, 3  ;;  %s659_s30 = sshll.u32 %s851_s16, 7 }
  0x13   : > { %s1076_s27 = scalar_select %p947_p11, 1, 0 }
  0x14   : > { %s958_s6 = scalar_lea.hbm %s1068_s0, %s659_s30  ;;  %s173_s7 = scalar_lea.vmem [#allocation3], %s641_s29 }
  0x15   : > { %s181_s8 = sshll.u32 %s173_s7, 4  ;;  %p964_p0 = pnand %p681_p13, %p930_p4  ;;  %s960_s8 = int_to_ptr.vmem [resolvable:$true] %s181_s8 }
  0x16   : > { %s170_s10 = scalar_lea.sflag [#allocation4], %s169_s28  ;;  %s743_s11 = scalar_lea.hbm %s958_s6, 128 }
  0x17   : > { %p744_p3 = scmp.ne.s32.totalorder %s958_s6, %s743_s11  ;;  %p745_p5 = pneg %p964_p0 }
  0x18   : > { %s748_s21 = scalar_lea.hbm %s1068_s0, 256  ;;  %p749_p4 = scmp.lt.u32.totalorder %s958_s6, %s1068_s0 }
  0x19   : > { %p746_p6 = pnand %p745_p5, %p744_p3  ;;  %p750_p10 = scmp.lt.u32.totalorder %s748_s21, %s743_s11 }
  0x1a   : > { %p752_p12 = scmp.lt.u32.totalorder %s743_s11, %s958_s6 }
  0x1b   : > { %p747_p7 = pneg %p746_p6  ;;  %p751_p13 = por %p750_p10, %p749_p4 }
  0x1d   : > { %p753_p1 = por %p752_p12, %p751_p13 }
  0x1f   : > { %p754_p2 = pnand %p753_p1, %p747_p7 }
  0x21   : > { %757 = shalt.err (!%p754_p2)
}
  0x22   : > { %s758_s28 = scalar_lea.vmem %s960_s8, 128  ;;  %s857_s29 = smov [#allocation3]  }
  0x23   : > { %p759_p3 = scmp.ne.s32.totalorder %s960_s8, %s758_s28  ;;  %s763_s30 = sshll.u32 %s857_s29, 4  ;;  %s764_s30 = int_to_ptr.vmem [resolvable:$false] %s763_s30 }
  0x24   : > { %s765_s4 = scalar_lea.vmem %s764_s30, 256  ;;  %p766_p9 = scmp.lt.s32.totalorder %s960_s8, %s764_s30 }
  0x25   : > { %p761_p6 = pnand %p759_p3, %p745_p5  ;;  %p767_p4 = scmp.lt.s32.totalorder %s765_s4, %s758_s28 }
  0x27   : > { %p762_p11 = pneg %p761_p6  ;;  %p768_p10 = por %p767_p4, %p766_p9 }
  0x29   : > { %p769_p12 = pnand %p768_p10, %p762_p11 }
  0x2b   : > { %772 = shalt.err (!%p769_p12)
}
  0x2c   : > { %676 = dma.hbm_to_vmem [thread:$0]  (!%p964_p0), %s958_s6, 128, %s960_s8, %s170_s10  }
  0x2d   : > { %p1078_p1 = scmp.lt.s32.totalorder %s855_s17, 3  ;;  %p1079_p2 = scmp.ge.s32.totalorder %s855_s17, 1 }
  0x2f   : > { %p187_p5 = pnand %p1079_p2, %p1078_p1 }
  0x30   : > { %s1000_s5 = sand.u32 (!%p187_p5), 1, %s839_s13  }
  0x31   : > { %190 = sbr.rel (%p187_p5) target bundleno = 451 (0x1c3), region = 32  ;;  %s645_s7 = sshll.u32 (!%p187_p5), %s1000_s5, 3 }
  0x32   : > { %s193_s11 = scalar_lea.sflag (!%p187_p5), [#allocation4], %s1000_s5  ;;  %s196_s18 = scalar_lea.vmem (!%p187_p5), [#allocation3], %s645_s7 }
  0x38   : > { %826 = dma.done.wait (%p936_p8), %s193_s11, 128  }
  0x39   : > { %828 = vsyncadd (%p936_p8), %s193_s11, 4294967168  ;;  %v236_v0 = vlaneseq  ;;  %v858_v1 = vmov 0.0   ;;  %v235_v8 = vld [vmem:[%s196_s18] sm:$0xff]  ;;  %s859_s24 = smov 16   ;;  %s860_s6 = smov 17   ;;  %v867_v21 = vmov 0  }
  0x3a   : > { %263 = vst [vmem:[#allocation2] sm:$0xff] %v858_v1  ;;  %264 = vst [vmem:[#allocation2 + $0x8] sm:$0xff] %v858_v1  ;;  %498 = vmatprep.mubr.f32.mxu0 %v858_v1  ;;  %v309_v9 = vrot.slane %v235_v8, 4  ;;  %v282_v10 = vcombine.high %v235_v8, %v235_v8  ;;  %s861_s8 = smov 15   ;;  %s862_s9 = smov 1   ;;  %741 = vset.pattern.permute.xlu0 %v867_v21  ;;  %v417_v22 = vld [vmem:[%s1070_s2] sm:$0xff] }
  0x3b   : > { %265 = vst [vmem:[#allocation2 + $0x10] sm:$0xff] %v858_v1  ;;  %266 = vst [vmem:[#allocation2 + $0x18] sm:$0xff] %v858_v1  ;;  %v237_v2 = vand.u32 127, %v236_v0  ;;  %s863_s10 = smov 127   ;;  %s864_s19 = smov 113   ;;  %vm319_vm4 = vcmask 1047684  }
  0x3c   : > { %267 = vst [vmem:[#allocation2 + $0x20] sm:$0xff] %v858_v1  ;;  %268 = vst [vmem:[#allocation2 + $0x28] sm:$0xff] %v858_v1  ;;  %311 = vrot.lane.b32.xlu1 %v309_v9, %s859_s24  ;;  %s865_s21 = smov 112   ;;  %s866_s22 = smov 111   ;;  %vm296_vm5 = vcmask 1043592   ;;  %vm342_vm6 = vcmask 1043576  }
  0x3d   : > { %269 = vst [vmem:[#allocation2 + $0x30] sm:$0xff] %v858_v1  ;;  %270 = vst [vmem:[#allocation2 + $0x38] sm:$0xff] %v858_v1  ;;  %v243_v3 = vand.u32 15, %v237_v2  ;;  %v238_v4 = vadd.s32 128, %v237_v2  ;;  %vm315_vm7 = vcmask 130048   ;;  %vm338_vm8 = vcmask 121856  }
  0x3e   : > { %271 = vst [vmem:[#allocation2 + $0x40] sm:$0xf] %v858_v1  ;;  %272 = vst [vmem:[#allocation2 + $0x48] sm:$0xf] %v858_v1  ;;  %vm292_vm9 = vcmask 138240   ;;  %vm355_vm10 = vcmask 1047564  }
  0x3f   : > { %v647_v5 = vadd.s32 1, %v243_v3  ;;  %v649_v6 = vadd.s32 4294967295, %v243_v3  ;;  %v250_v7 = vand.u32 15, %v238_v4  ;;  %358 = vst [vmem:[#allocation2 + $0x20] sm:$0xf] %v235_v8  ;;  %vm351_vm11 = vcmask 7168  }
  0x40   : > { %359 = vst [vmem:[#allocation2 + $0x28] sm:$0xf] %v282_v10  ;;  %313 = vrot.lane.b32.xlu1 %v282_v10, %s859_s24  ;;  %vm366_vm12 = vcmask 1039360   ;;  %vm371_vm13 = vcmask 1039364   ;;  %vm377_vm14 = vcmask 924672   ;;  %vm382_vm15 = vcmask 920576  }
  0x41   : > { %vm277_vm0 = vcmp.lt.s32.totalorder %v647_v5, 16  ;;  %vm324_vm1 = vcmp.ge.s32.totalorder %v649_v6, 0  ;;  %v650_v12 = vadd.s32 4294967295, %v250_v7  ;;  %v648_v13 = vadd.s32 1, %v250_v7  ;;  %v406_v61 = vld [vmem:[%s1069_s1] sm:$0xff]  ;;  %s646_s4 = sshll.u32 %s1000_s5, 4 }
  0x42   : > { %v284_v11 = vsel %vm277_vm0, %v235_v8, 0.0  ;;  %v330_v14 = vsel %vm324_vm1, %v235_v8, 0.0  ;;  %vm388_vm0 = vcmask 916480   ;;  %vm393_vm1 = vcmask 916484   ;;  %s660_s7 = sshll.u32 %s847_s15, 8  ;;  %s226_s11 = scalar_lea.vmem [#allocation6], %s646_s4 }
  0x43   : > { %288 = vrot.lane.b32.xlu0 %v284_v11, %s860_s6  ;;  %vm325_vm2 = vcmp.ge.s32.totalorder %v650_v12, 0  ;;  %vm278_vm3 = vcmp.lt.s32.totalorder %v648_v13, 16  ;;  %v345_v17 = vrot.slane %v284_v11, 4  ;;  %v360_v19 = vrot.slane %v330_v14, 4  ;;  %s524_s18 = sshll.u32 %s226_s11, 4  ;;  %p1080_p9 = scmp.ne.s32.totalorder %s1075_s25, 0  ;;  %s1021_s18 = int_to_ptr.vmem [resolvable:$true] %s524_s18 }
  0x44   : > { %v331_v15 = vsel %vm325_vm2, %v282_v10, 0.0  ;;  %v285_v16 = vsel %vm278_vm3, %v282_v10, 0.0  ;;  %vm399_vm2 = vcmask 908288   ;;  %vm404_vm3 = vcmask 904192   ;;  %s773_s15 = scalar_lea.vmem %s1021_s18, 256 }
  0x45   : > { %336 = vrot.lane.b32.xlu1 %v331_v15, %s861_s8  ;;  %v346_v18 = vrot.slane %v285_v16, 4  ;;  %v361_v20 = vrot.slane %v331_v15, 4  ;;  %p774_p8 = scmp.ne.s32.totalorder %s1021_s18, %s773_s15 }
  0x47   : > { %334 = vrot.lane.b32.xlu0 %v330_v14, %s861_s8  ;;  %s1019_s8 = scalar_lea.hbm %s1071_s3, %s660_s7  ;;  %p775_p11 = pnand %p774_p8, %p1080_p9 }
  0x49   : > { %349 = vrot.lane.b32.xlu1 %v346_v18, %s862_s9  ;;  %p776_p0 = pneg %p775_p11 }
  0x4b   : > { %290 = vrot.lane.b32.xlu0 %v285_v16, %s860_s6 }
  0x4d   : > { %364 = vrot.lane.b32.xlu1 %v361_v20, %s863_s10 }
  0x4f   : > { %347 = vrot.lane.b32.xlu0 %v345_v17, %s862_s9  ;;  %s508_s9 = scalar_lea.sflag [#allocation5], %s1000_s5 }
  0x51   : > { %375 = vrot.lane.b32.xlu1 %v285_v16, %s864_s19 }
  0x53   : > { %362 = vrot.lane.b32.xlu0 %v360_v19, %s863_s10  ;;  %s868_s10 = smov [#allocation6]  }
  0x55   : > { %386 = vrot.lane.b32.xlu1 %v282_v10, %s865_s21 }
  0x57   : > { %373 = vrot.lane.b32.xlu0 %v284_v11, %s864_s19  ;;  %s777_s19 = sshll.u32 %s868_s10, 4  ;;  %s778_s19 = int_to_ptr.vmem [resolvable:$false] %s777_s19 }
  0x58   : > { %p780_p7 = scmp.lt.s32.totalorder %s1021_s18, %s778_s19 }
  0x59   : > { %397 = vrot.lane.b32.xlu1 %v331_v15, %s866_s22 }
  0x5b   : > { %384 = vrot.lane.b32.xlu0 %v309_v9, %s865_s21  ;;  %s779_s21 = scalar_lea.vmem %s778_s19, 512 }
  0x5c   : > { %p781_p13 = scmp.lt.s32.totalorder %s779_s21, %s773_s15 }
  0x5e   : > { %p782_p3 = por %p781_p13, %p780_p7 }
  0x5f   : > { %395 = vrot.lane.b32.xlu0 %v330_v14, %s866_s22 }
  0x60   : > { %p783_p6 = pnand %p782_p3, %p776_p0 }
  0x63   : > { %420 = vperm.xlu0 %741, %v417_v22  }
  0xae   : > { %v312_v23 = vpop.permute.xlu1 %311 }
  0xaf   : > { %320 = vst.msk [vmem:[#allocation2] sm:$0xf0] %vm319_vm4, %v312_v23  ;;  %vm427_vm4 = vcmask 1043456  }
  0xb2   : > { %v314_v26 = vpop.permute.xlu1 %313 }
  0xb3   : > { %v316_v27 = vsel %vm315_vm7, %v312_v23, %v314_v26 }
  0xb4   : > { %321 = vst [vmem:[#allocation2 + $0x8] sm:$0xf0] %v316_v27 }
  0xb5   : > { %v289_v24 = vpop.permute.xlu0 %288 }
  0xb6   : > { %297 = vst.msk [vmem:[#allocation2] sm:$0xf] %vm296_vm5, %v289_v24  ;;  %vm423_vm5 = vcmask 293888  }
  0xb7   : > { %v337_v28 = vpop.permute.xlu1 %336 }
  0xb9   : > { %v335_v25 = vpop.permute.xlu0 %334 }
  0xba   : > { %343 = vst.msk [vmem:[#allocation2 + $0x10] sm:$0xf] %vm342_vm6, %v335_v25  ;;  %v339_v30 = vsel %vm338_vm8, %v335_v25, %v337_v28 }
  0xbb   : > { %344 = vst [vmem:[#allocation2 + $0x18] sm:$0xf] %v339_v30  ;;  %v350_v33 = vpop.permute.xlu1 %349 }
  0xbd   : > { %v291_v29 = vpop.permute.xlu0 %290  ;;  %v407_v45 = vld [vmem:[#allocation2] sm:$0xff] }
  0xbe   : > { %v293_v31 = vsel %vm292_vm9, %v289_v24, %v291_v29 }
  0xbf   : > { %298 = vst [vmem:[#allocation2 + $0x8] sm:$0xf] %v293_v31  ;;  %v365_v36 = vpop.permute.xlu1 %364 }
  0xc0   : > { %372 = vst.msk [vmem:[#allocation2 + $0x28] sm:$0xf0] %vm371_vm13, %v365_v36 }
  0xc1   : > { %v348_v32 = vpop.permute.xlu0 %347 }
  0xc2   : > { %356 = vst.msk [vmem:[#allocation2 + $0x10] sm:$0xf0] %vm355_vm10, %v348_v32  ;;  %v352_v34 = vsel %vm351_vm11, %v348_v32, %v350_v33 }
  0xc3   : > { %357 = vst [vmem:[#allocation2 + $0x18] sm:$0xf0] %v352_v34  ;;  %v376_v39 = vpop.permute.xlu1 %375 }
  0xc4   : > { %383 = vst.msk [vmem:[#allocation2 + $0x38] sm:$0xf] %vm382_vm15, %v376_v39 }
  0xc5   : > { %v363_v35 = vpop.permute.xlu0 %362 }
  0xc6   : > { %v367_v37 = vsel %vm366_vm12, %v363_v35, %v365_v36  ;;  %v408_v42 = vld [vmem:[#allocation2 + $0x8] sm:$0xff] }
  0xc7   : > { %370 = vst [vmem:[#allocation2 + $0x20] sm:$0xf0] %v367_v37  ;;  %v387_v48 = vpop.permute.xlu1 %386  ;;  %v412_v53 = vld [vmem:[#allocation2 + $0x28] sm:$0xff] }
  0xc8   : > { %394 = vst.msk [vmem:[#allocation2 + $0x38] sm:$0xf0] %vm393_vm1, %v387_v48 }
  0xc9   : > { %v374_v38 = vpop.permute.xlu0 %373  ;;  %v409_v40 = vld [vmem:[#allocation2 + $0x10] sm:$0xff] }
  0xca   : > { %v378_v41 = vsel %vm377_vm14, %v374_v38, %v376_v39  ;;  %v410_v43 = vld [vmem:[#allocation2 + $0x18] sm:$0xff]  ;;  %v663_v46 = vpack.c.bf16 %v409_v40, %v407_v45 }
  0xcb   : > { %381 = vst [vmem:[#allocation2 + $0x30] sm:$0xf] %v378_v41  ;;  %v661_v44 = vpack.c.bf16 %v410_v43, %v408_v42  ;;  %v398_v51 = vpop.permute.xlu1 %397 }
  0xcc   : > { %405 = vst.msk [vmem:[#allocation2 + $0x48] sm:$0xf] %vm404_vm3, %v398_v51 }
  0xcd   : > { %v385_v47 = vpop.permute.xlu0 %384  ;;  %662 = vmatprep.subr.bf16.mxu0 %v661_v44 }
  0xce   : > { %v389_v49 = vsel %vm388_vm0, %v385_v47, %v387_v48  ;;  %664 = vmatpush1.bf16.msra.mxu0 %v663_v46  ;;  %v411_v56 = vld [vmem:[#allocation2 + $0x20] sm:$0xff] }
  0xcf   : > { %392 = vst [vmem:[#allocation2 + $0x30] sm:$0xf0] %v389_v49  ;;  %v414_v54 = vld [vmem:[#allocation2 + $0x38] sm:$0xff] }
  0xd0   : > { %v665_v55 = vpack.c.bf16 %v414_v54, %v412_v53 }
  0xd1   : > { %v396_v50 = vpop.permute.xlu0 %395 }
  0xd2   : > { %v400_v52 = vsel %vm399_vm2, %v396_v50, %v398_v51  ;;  %666 = vmatprep.subr.bf16.mxu0 %v665_v55 }
  0xd3   : > { %403 = vst [vmem:[#allocation2 + $0x40] sm:$0xf] %v400_v52  ;;  %v416_v59 = vld [vmem:[#allocation2 + $0x48] sm:$0xf] }
  0xd6   : > { %v413_v57 = vld [vmem:[#allocation2 + $0x30] sm:$0xff] }
  0xd7   : > { %v667_v58 = vpack.c.bf16 %v413_v57, %v411_v56 }
  0xd9   : > { %668 = vmatpush1.bf16.msra.mxu0 %v667_v58 }
  0xda   : > { %651 = vmatprep.subr.msk.mxu0 %vm427_vm4, %v416_v59  ;;  %v415_v60 = vld [vmem:[#allocation2 + $0x40] sm:$0xf] }
  0xdd   : > { %652 = vmatpush1.msk.msra.mxu0 %vm427_vm4, %v415_v60 }
  0xde   : > { %653 = vmatmul.mubr.msk.f32.vlgmr.msra.gmra.mrb[0].mxu0 %vm423_vm5, %v406_v61 }
  0xe2   : > { %v421_v62 = vpop.permute.xlu0 %420 }
 0x1b1   : > { %v500_v63 = vpop.f32.mrb[0].mxu0 }
 0x1b2   : > { %v501_v0 = vadd.f32 %v500_v63, %v421_v62  ;;  %v502_v1 = vpop.f32.mrb[1].mxu0 }
 0x1b3   : > { %v503_v2 = vadd.f32 %v502_v1, %v421_v62 }
 0x1b4   : > { %505 = vst [vmem:[%s226_s11] sm:$0xff] %v501_v0 }
 0x1b5   : > { %506 = vst [vmem:[%s226_s11 + $0x8] sm:$0xff] %v503_v2 }
 0x1b6   : > { %786 = shalt.err (!%p783_p6)
}
 0x1b7   : > { %s787_s5 = scalar_lea.hbm %s1019_s8, 256  ;;  %s791_s28 = scalar_lea.hbm %s1071_s3, 512 }
 0x1b8   : > { %p788_p4 = scmp.ne.s32.totalorder %s1019_s8, %s787_s5  ;;  %p792_p1 = scmp.lt.u32.totalorder %s1019_s8, %s1071_s3 }
 0x1b9   : > { %p793_p2 = scmp.lt.u32.totalorder %s791_s28, %s787_s5  ;;  %p795_p8 = scmp.lt.u32.totalorder %s787_s5, %s1019_s8 }
 0x1ba   : > { %p789_p10 = pnand %p788_p4, %p1080_p9 }
 0x1bb   : > { %p794_p5 = por %p793_p2, %p792_p1 }
 0x1bc   : > { %p790_p12 = pneg %p789_p10 }
 0x1bd   : > { %p796_p11 = por %p795_p8, %p794_p5 }
 0x1bf   : > { %p797_p0 = pnand %p796_p11, %p790_p12 }
 0x1c1   : > { %800 = shalt.err (!%p797_p0)
}
 0x1c2   : > { %671 = dma.vmem_to_hbm [thread:$0]  (%p1080_p9), %s1021_s18, 256, %s1019_s8, %s508_s9  }
 0x1c3 PF: > { %s536_s4 = sand.u32 1, %s835_s12   ;;  %p1081_p7 = scmp.ne.s32.totalorder %s1076_s27, 0 }
 0x1c4   : > { %p1082_p13 = scmp.ge.s32.totalorder %s855_s17, 2  ;;  %s537_s7 = scalar_lea.sflag [#allocation5], %s536_s4 }
 0x1c6   : > { %p678_p3 = pnand %p1082_p13, %p1081_p7 }
 0x1c8   : > { %830 = dma.done.wait (!%p678_p3), %s537_s7, 256  }
 0x1c9   : > { %832 = vsyncadd (!%p678_p3), %s537_s7, 4294967040  ;;  %s19_s17 = sadd.s32 1, %s855_s17   ;;  %s1083_s12 = smov %s839_s13 }
 0x1ca   : > { %p16_p6 = scmp.ge.s32.totalorder %s19_s17, 4   ;;  %s1084_s13 = smov %s843_s14 }
 0x1cb   : > { %s1085_s14 = smov %s945_s26  ;;  %s1086_s15 = smov %s851_s16 }
 0x1cc   : > { %s1087_s16 = smov %s1089_s20  ;;  %18 = sbr.rel (!%p16_p6) target bundleno = 6 (0x6), region = 83 }
 0x1d3   :  { %542 = vsyncpa [#allocation4], 1 }
 0x1d4   :  { %544 = vsyncpa [#allocation4 + $0x1], 1 }
 0x1d5   :  { %545 = vsyncpa [#allocation5], 1 }
 0x1d6   :  { %547 = vsyncpa [#allocation5 + $0x1], 1 }

</bundles_post_ra>
